<compile_context>
chip_gen: v7x
topology: tpu7x:2x2x1
jax: 0.10.0
libtpu: 0.0.40
codegen_flags: <defaults>
</compile_context>

<pallas_src>
import jax
import jax.numpy as jnp
from jax.experimental import pallas as pl
from jax.experimental.pallas import tpu as pltpu

LAMBDA_SOFTMAX = 20.0
_NEG_BIG = -1e30  # "minus infinity" for masked columns (exp underflows to 0)


def _make_kernel(n_valid: int, b_pad: int, tm: int):
    """Build the per-stripe kernel. n_valid = real batch size, b_pad >= n_valid."""
    needs_col_mask = n_valid < b_pad

    def kernel(sim_ref, out_ref):
        i = pl.program_id(0)
        sim = sim_ref[...].astype(jnp.float32)            # (TM, B_pad)
        z = sim * LAMBDA_SOFTMAX

        col = jax.lax.broadcasted_iota(jnp.int32, (tm, b_pad), 1)
        row = jax.lax.broadcasted_iota(jnp.int32, (tm, b_pad), 0)

        if needs_col_mask:
            z = jnp.where(col < n_valid, z, _NEG_BIG)     # kill padded columns

        # ---- first softmax: p = softmax(20 * sim, axis=1) ------------------
        m1 = jnp.max(z, axis=1, keepdims=True)            # (TM, 1)
        e1 = jnp.exp(z - m1)                              # (TM, B_pad)  (EUP)
        s1 = jnp.sum(e1, axis=1, keepdims=True)           # (TM, 1)
        inv = 1.0 / s1                                    # reciprocal on TM elems only
        p = e1 * inv                                      # (TM, B_pad)

        # ---- cross-entropy's log_softmax over p -----------------------------
        # p in [0, 1] => exp(p) in [1, e]: no max-shift needed.
        e2 = jnp.exp(p)                                   # (EUP)
        if needs_col_mask:
            e2 = jnp.where(col < n_valid, e2, 0.0)
        lse = jnp.log(jnp.sum(e2, axis=1, keepdims=True)) # (TM, 1)

        # p[i,i] extracted in-kernel: diagonal of this stripe lives at global
        # column (i*TM + local_row). Iota compare + lane reduce -> VPU/XLU,
        # which have slack (no extra DMA stream, no XLA gather pass).
        diag_e1 = jnp.sum(jnp.where(col == row + i * tm, e1, 0.0),
                          axis=1, keepdims=True)          # (TM, 1)
        p_diag = diag_e1 * inv

        out_ref[...] = lse - p_diag                       # per-row loss (f32)

    return kernel


def _vmem_capacity_bytes() -> int:
    """Physical VMEM of the attached TPU generation (v5e/v6e: 128 MiB, v7x: 64 MiB)."""
    try:
        return int(pltpu.get_tpu_info().vmem_capacity_bytes)
    except Exception:
        return 64 * 1024 * 1024  # conservative (v7x-sized) fallback


def _choose_tile_rows(B: int, itemsize: int, vmem_capacity_bytes: int) -> int:
    """Row tile (TM) heuristic.

    Goals: >= 8 grid steps when B permits (pipeline depth + v7x megacore),
    TM in [16..512] and a multiple of 16 (native bf16 sublane tiling), and a
    per-step working set (double-buffered input stripe + ~6 f32 temporaries)
    within ~1/3 of physical VMEM. Prefer a TM that divides B to avoid padding.
    """
    if B <= 16:
        return B  # tiny batch: single full-extent tile is legal and cheapest

    budget = vmem_capacity_bytes // 3
    per_row_bytes = (2 * itemsize + 6 * 4) * max(B, 128)
    tm_fit = budget // per_row_bytes          # VMEM-feasible rows per stripe
    tm_steps = max(16, B // 8)                # aim for >= 8 grid steps
    tm = int(min(512, tm_fit, tm_steps))
    tm = max(16, (tm // 16) * 16)             # multiple of 16

    # Prefer a divisor of B (no padding) without shrinking TM below ~half target.
    for cand in range(tm, max(15, tm // 2 - 1), -16):
        if B % cand == 0:
            return cand
    return tm                                 # no nice divisor: wrapper pads B


def contrastive_loss(sim: jax.Array, tile_rows: int | None = None) -> jax.Array:
    """sim: (B, B) similarity matrix (any float dtype). Returns scalar loss."""
    B = sim.shape[0]
    assert sim.shape == (B, B), sim.shape
    itemsize = jnp.dtype(sim.dtype).itemsize
    vmem_cap = _vmem_capacity_bytes()

    TM = tile_rows if tile_rows is not None else _choose_tile_rows(B, itemsize, vmem_cap)
    B_pad = ((B + TM - 1) // TM) * TM
    if B_pad != B:
        # Awkward B: pad to a TM multiple; padded columns are masked in-kernel,
        # padded rows' losses are discarded before the mean.
        sim = jnp.pad(sim, ((0, B_pad - B), (0, B_pad - B)))

    grid = (B_pad // TM,)
    kernel = _make_kernel(B, B_pad, TM)

    per_row = pl.pallas_call(
        kernel,
        out_shape=jax.ShapeDtypeStruct((B_pad, 1), jnp.float32),
        grid=grid,
        in_specs=[
            pl.BlockSpec((TM, B_pad), lambda i: (i, 0)),   # row stripe of sim
        ],
        out_specs=pl.BlockSpec((TM, 1), lambda i: (i, 0)),
        compiler_params=pltpu.CompilerParams(
            dimension_semantics=("parallel",),             # tiles are independent
            vmem_limit_bytes=int(2 * vmem_cap // 3),       # generation-aware headroom
        ),
        cost_estimate=pl.CostEstimate(
            flops=int(6 * B_pad * B_pad),
            transcendentals=int(2 * B_pad * B_pad),
            bytes_accessed=int(B_pad * B_pad * itemsize + 4 * B_pad),
        ),
    )(sim)

    return jnp.mean(per_row[:B, 0])  # CrossEntropyLoss reduction='mean'


def _reference(sim):
    # Pure-JAX reference matching the PyTorch module exactly.
    z = sim.astype(jnp.float32) * LAMBDA_SOFTMAX
    p = jax.nn.softmax(z, axis=1)
    logp = jax.nn.log_softmax(p, axis=1)
    B = sim.shape[0]
    return -jnp.mean(logp[jnp.arange(B), jnp.arange(B)])


if __name__ == "__main__":
    key = jax.random.PRNGKey(0)

    # Small square similarity matrix, as the module's forward implies.
    B = 16
    sim = jax.random.normal(key, (B, B), dtype=jnp.float32)
    ref = _reference(sim)

    # Force TM=8 so the test exercises a multi-tile grid (grid=(2,)), no padding.
    loss = contrastive_loss(sim, tile_rows=8)
    jax.block_until_ready(loss)
    assert jnp.allclose(loss, ref, atol=1e-5, rtol=1e-5), (loss, ref)

    # Auto tile selection (single full-extent tile for such a tiny B).
    loss2 = contrastive_loss(sim)
    jax.block_until_ready(loss2)
    assert jnp.allclose(loss2, ref, atol=1e-5, rtol=1e-5), (loss2, ref)

    # Awkward B: exercises the pad + in-kernel column-mask path (24 -> 32, grid=(2,)).
    B2 = 24
    sim2 = jax.random.normal(jax.random.PRNGKey(1), (B2, B2), dtype=jnp.float32)
    loss3 = contrastive_loss(sim2)
    jax.block_until_ready(loss3)
    ref3 = _reference(sim2)
    assert jnp.allclose(loss3, ref3, atol=1e-5, rtol=1e-5), (loss3, ref3)

    print("KERNEL_OK")
</pallas_src>

<mosaic_0001>
module attributes {stable_mosaic.version = 11 : i64} {
  func.func @kernel(%arg0: i32, %arg1: memref<8x16xf32, #tpu.memory_space<vmem>>, %arg2: memref<8x1xf32, #tpu.memory_space<vmem>>) attributes {dimension_semantics = [#tpu.dimension_semantics<parallel>], iteration_bounds = array<i64: 2>, scalar_prefetch = 0 : i64, scratch_operands = 0 : i64, tpu.core_type = #tpu.core_type<tc>, window_params = [{transform_indices = @transform_0, window_bounds = array<i64: 8, 16>}, {transform_indices = @transform_1, window_bounds = array<i64: 8, 1>}]} {
    %c0 = arith.constant 0 : index
    %c0_0 = arith.constant 0 : index
    %0 = vector.load %arg1[%c0, %c0_0] : memref<8x16xf32, #tpu.memory_space<vmem>>, vector<8x16xf32>
    %cst = arith.constant 2.000000e+01 : f32
    %1 = vector.broadcast %cst : f32 to vector<8x16xf32>
    %2 = arith.mulf %0, %1 : vector<8x16xf32>
    %3 = tpu.iota {dimensions = array<i32: 1>} : vector<8x16xi32>
    %4 = tpu.iota {dimensions = array<i32: 0>} : vector<8x16xi32>
    %cst_1 = arith.constant dense<0xFF800000> : vector<8xf32>
    %5 = vector.multi_reduction <maximumf>, %2, %cst_1 [1] : vector<8x16xf32> to vector<8xf32>
    %6 = vector.shape_cast %5 : vector<8xf32> to vector<8x1xf32>
    %7 = vector.broadcast %6 : vector<8x1xf32> to vector<8x16xf32>
    %8 = arith.subf %2, %7 : vector<8x16xf32>
    %9 = math.exp %8 : vector<8x16xf32>
    %cst_2 = arith.constant dense<0.000000e+00> : vector<8xf32>
    %10 = vector.multi_reduction <add>, %9, %cst_2 [1] : vector<8x16xf32> to vector<8xf32>
    %11 = vector.shape_cast %10 : vector<8xf32> to vector<8x1xf32>
    %cst_3 = arith.constant 1.000000e+00 : f32
    %12 = vector.broadcast %cst_3 : f32 to vector<8x1xf32>
    %13 = arith.divf %12, %11 : vector<8x1xf32>
    %14 = vector.broadcast %13 : vector<8x1xf32> to vector<8x16xf32>
    %15 = arith.mulf %9, %14 : vector<8x16xf32>
    %16 = math.exp %15 : vector<8x16xf32>
    %cst_4 = arith.constant dense<0.000000e+00> : vector<8xf32>
    %17 = vector.multi_reduction <add>, %16, %cst_4 [1] : vector<8x16xf32> to vector<8xf32>
    %18 = vector.shape_cast %17 : vector<8xf32> to vector<8x1xf32>
    %19 = math.log %18 : vector<8x1xf32>
    %c8_i32 = arith.constant 8 : i32
    %20 = arith.muli %arg0, %c8_i32 : i32
    %21 = vector.broadcast %20 : i32 to vector<8x16xi32>
    %22 = arith.addi %4, %21 : vector<8x16xi32>
    %23 = arith.cmpi eq, %3, %22 : vector<8x16xi32>
    %cst_5 = arith.constant 0.000000e+00 : f32
    %24 = vector.broadcast %cst_5 : f32 to vector<8x16xf32>
    %25 = arith.select %23, %9, %24 : vector<8x16xi1>, vector<8x16xf32>
    %cst_6 = arith.constant dense<0.000000e+00> : vector<8xf32>
    %26 = vector.multi_reduction <add>, %25, %cst_6 [1] : vector<8x16xf32> to vector<8xf32>
    %27 = vector.shape_cast %26 : vector<8xf32> to vector<8x1xf32>
    %28 = arith.mulf %27, %13 : vector<8x1xf32>
    %29 = arith.subf %19, %28 : vector<8x1xf32>
    %c0_7 = arith.constant 0 : index
    %c0_8 = arith.constant 0 : index
    %30 = vector.load %arg2[%c0_7, %c0_8] : memref<8x1xf32, #tpu.memory_space<vmem>>, vector<8x1xf32>
    tpu.vector_store %arg2[%c0_7, %c0_8], %29 {strides = array<i32>} : memref<8x1xf32, #tpu.memory_space<vmem>>, vector<8x1xf32>,
    return
  }
  func.func @transform_0(%arg0: i32) -> (i32, i32) {
    %c0_i32 = arith.constant 0 : i32
    %c0_i32_0 = arith.constant 0 : i32
    return %arg0, %c0_i32 : i32, i32
  }
  func.func @transform_1(%arg0: i32) -> (i32, i32) {
    %c0_i32 = arith.constant 0 : i32
    %c0_i32_0 = arith.constant 0 : i32
    return %arg0, %c0_i32 : i32, i32
  }
}

</mosaic_0001>

<bundles_post_ra>
// kernel: tpu_custom_call.1
= control target key start
LH: loop header
LB: loop body
LE: loop exit
PB: predicated region body
PF: predicated region fallthrough
CT: control target
= control target key end

     0   :  { %6 = vsyncpa [#allocation3], 0  ;;  %s482_s0 = inlined_call_operand.hbm [shape: f32[16,16], index: 0, kind: input, shape index: {}]   ;;  %s483_s1 = inlined_call_operand.vmem [shape: f32[16,1], index: 1, kind: output, shape index: {}]  }
   0x1   :  { %8 = vsyncpa [#allocation3 + $0x1], 0  ;;  %s370_s6 = smov 0   ;;  %s372_s7 = smov 0  }
   0x2   :  { %s374_s8 = smov 0   ;;  %s376_s9 = smov 0  }
   0x3 LB: > { %s389_s10 = sadd.s32 4294967295, %s357_s9   ;;  %s392_s11 = sadd.s32 1, %s357_s9   ;;  %s357_s9 = sphi %s376_s9, %s491_s9   ;;  %s353_s8 = sphi %s374_s8, %s490_s8   ;;  %s349_s7 = sphi %s372_s7, %s489_s7   ;;  %s345_s6 = sphi %s370_s6, %s488_s6  }
   0x4   : > { %s18_s12 = ssub.s32 %s357_s9, %s392_s11  ;;  %s21_s13 = sadd.s32 1, %s353_s8 }
   0x5   : > { %p19_p0 = scmp.eq.s32.totalorder %s18_s12, 0  ;;  %p28_p1 = scmp.ne.s32.totalorder %s353_s8, %s349_s7 }
   0x6   : > { %p29_p2 = scmp.eq.s32.totalorder %s357_s9, 0  ;;  %p34_p3 = scmp.ne.s32.totalorder %s349_s7, %s345_s6 }
   0x7   : > { %s402_s14 = scalar_select %p19_p0, %s353_s8, %s21_s13  }
   0x8   : > { %p30_p4 = por %p29_p2, %p28_p1  ;;  %p35_p5 = scmp.eq.s32.totalorder %s389_s10, 0 }
   0x9   : > { %p252_p6 = scmp.lt.s32.totalorder %s357_s9, 2  ;;  %s84_s16 = sand.u32 1, %s353_s8  }
   0xa   : > { %p406_p7 = por %p35_p5, %p34_p3  ;;  %s238_s17 = sshll.u32 %s84_s16, 3 }
   0xb   : > { %s239_s18 = sshll.u32 %s357_s9, 7  ;;  %s88_s22 = scalar_lea.vmem [#allocation2], %s238_s17 }
   0xc   : > { %s415_s21 = scalar_lea.hbm %s482_s0, %s239_s18  ;;  %s95_s23 = sshll.u32 %s88_s22, 4  ;;  %s417_s23 = int_to_ptr.vmem [resolvable:$true] %s95_s23 }
   0xd   : > { %p419_p8 = pnand %p252_p6, %p30_p4  ;;  %s85_s25 = scalar_lea.sflag [#allocation3], %s84_s16 }
   0xe   : > { %s293_s26 = scalar_lea.hbm %s415_s21, 128  ;;  %s298_s29 = scalar_lea.hbm %s482_s0, 256 }
   0xf   : > { %p294_p11 = scmp.ne.s32.totalorder %s415_s21, %s293_s26  ;;  %p295_p12 = pneg %p419_p8 }
  0x10   : > { %p299_p1 = scmp.lt.u32.totalorder %s415_s21, %s482_s0  ;;  %p300_p2 = scmp.lt.u32.totalorder %s298_s29, %s293_s26 }
  0x11   : > { %p296_p13 = pnand %p295_p12, %p294_p11  ;;  %p302_p4 = scmp.lt.u32.totalorder %s293_s26, %s415_s21 }
  0x12   : > { %p301_p3 = por %p300_p2, %p299_p1 }
  0x13   : > { %p297_p0 = pneg %p296_p13 }
  0x14   : > { %p303_p5 = por %p302_p4, %p301_p3 }
  0x16   : > { %p304_p6 = pnand %p303_p5, %p297_p0 }
  0x18   : > { %307 = shalt.err (!%p304_p6)
}
  0x19   : > { %s308_s3 = scalar_lea.vmem %s417_s23, 128  ;;  %s359_s4 = smov [#allocation2]  }
  0x1a   : > { %p309_p11 = scmp.ne.s32.totalorder %s417_s23, %s308_s3  ;;  %s313_s5 = sshll.u32 %s359_s4, 4  ;;  %s314_s5 = int_to_ptr.vmem [resolvable:$false] %s313_s5 }
  0x1b   : > { %s315_s6 = scalar_lea.vmem %s314_s5, 256  ;;  %p316_p10 = scmp.lt.s32.totalorder %s417_s23, %s314_s5 }
  0x1c   : > { %p311_p13 = pnand %p309_p11, %p295_p12  ;;  %p317_p1 = scmp.lt.s32.totalorder %s315_s6, %s308_s3 }
  0x1e   : > { %p312_p9 = pneg %p311_p13  ;;  %p318_p2 = por %p317_p1, %p316_p10 }
  0x20   : > { %p319_p3 = pnand %p318_p2, %p312_p9 }
  0x22   : > { %322 = shalt.err (!%p319_p3)
}
  0x23   : > { %251 = dma.hbm_to_vmem [thread:$0]  (!%p419_p8), %s415_s21, 128, %s417_s23, %s85_s25  }
  0x24   : > { %p486_p0 = scmp.lt.s32.totalorder %s357_s9, 3  ;;  %p487_p4 = scmp.ge.s32.totalorder %s357_s9, 1 }
  0x26   : > { %p101_p12 = pnand %p487_p4, %p486_p0 }
  0x27   : > { %s106_s12 = sand.u32 (!%p101_p12), 1, %s349_s7  }
  0x28   : > { %104 = sbr.rel (%p101_p12) target bundleno = 537 (0x219), region = 24  ;;  %s241_s13 = sshll.u32 (!%p101_p12), %s106_s12, 3 }
  0x29   : > { %s107_s16 = scalar_lea.sflag (!%p101_p12), [#allocation3], %s106_s12  ;;  %s110_s17 = scalar_lea.vmem (!%p101_p12), [#allocation2], %s241_s13 }
  0x2f   : > { %340 = dma.done.wait (%p406_p7), %s107_s16, 128  }
  0x30   : > { %342 = vsyncadd (%p406_p7), %s107_s16, 4294967168  ;;  %v132_v0 = vld [vmem:[%s110_s17] sm:$0xff]  ;;  %vm138_vm0 = vcmask 130048   ;;  %v134_v11 = vlaneseq  ;;  %s243_s9 = sshll.u32 %s389_s10, 3  ;;  %p128_p7 = scmp.lt.s32.totalorder %s389_s10, 1  ;;  %vm168_vm2 = vcmask 7168  }
  0x31   : > { %v133_v1 = vmul.f32 20.0, %v132_v0  ;;  %v159_v14 = vstv %s243_s9 }
  0x32   : > { %v137_v13 = vshrl.u32 %v134_v11, 7  ;;  %v135_v15 = vand.u32 127, %v134_v11  ;;  %s493_s10 = smov (!%p128_p7, %s389_s10), 1 }
  0x33   : > { %v139_v2 = vsel %vm138_vm0, %v133_v1, -inf  ;;  %s242_s15 = sshll.u32 %s493_s10, 3 }
  0x34   : > { %140 = vmax.xlane.f32.xlu0 %v139_v2  ;;  %v160_v16 = vadd.s32 %v159_v14, %v137_v13  ;;  %s131_s20 = scalar_lea.vmem %s483_s1, %s242_s15 }
  0x36   : > { %vm161_vm1 = vcmp.eq.s32.totalorder %v135_v15, %v160_v16 }
  0xc1   : > { %v141_v3 = vpop.xlane.xlu0 %140 }
  0xc2   : > { %v142_v4 = vsub.f32 %v133_v1, %v141_v3 }
  0xc4   : > { %v143_v5 = vmul.f32 1.442695, %v142_v4 }
  0xc6   : > { %285 = vpow2.f32 %v143_v5 }
  0xd0   : > { %v286_v6 = vpop.eup %285 }
  0xd1   : > { %v145_v7 = vsel %vm138_vm0, %v286_v6, 0.0  ;;  %v162_v19 = vsel %vm161_vm1, %v286_v6, 0.0 }
  0xd2   : > { %146 = vadd.xlane.f32.xlu0 %v145_v7  ;;  %v163_v20 = vsel %vm138_vm0, %v162_v19, 0.0 }
 0x15f   : > { %v147_v8 = vpop.xlane.xlu0 %146 }
 0x160   : > { %287 = vrcp.f32 %v147_v8 }
 0x16a   : > { %v288_v9 = vpop.eup %287 }
 0x16b   : > { %v150_v10 = vmul.f32 %v288_v9, %v286_v6 }
 0x16d   : > { %v151_v12 = vmul.f32 1.442695, %v150_v10 }
 0x16f   : > { %289 = vpow2.f32 %v151_v12 }
 0x179   : > { %v290_v17 = vpop.eup %289 }
 0x17a   : > { %v153_v18 = vsel %vm138_vm0, %v290_v17, 0.0 }
 0x17b   : > { %154 = vadd.xlane.f32.xlu1 %v153_v18 }
 0x17f   : > { %164 = vadd.xlane.f32.xlu1 %v163_v20 }
 0x208   : > { %v155_v21 = vpop.xlane.xlu1 %154 }
 0x209   : > { %291 = vlog2.f32 %v155_v21 }
 0x20c   : > { %v165_v22 = vpop.xlane.xlu1 %164 }
 0x20d   : > { %v166_v25 = vmul.f32 %v288_v9, %v165_v22 }
 0x213   : > { %v292_v23 = vpop.eup %291 }
 0x214   : > { %v157_v24 = vmul.f32 0.6931472, %v292_v23 }
 0x216   : > { %v167_v26 = vsub.f32 %v157_v24, %v166_v25 }
 0x218   : > { %169 = vst.msk [vmem:[%s131_s20] sm:$0xff] %vm168_vm2, %v167_v26 }
 0x219 PF: > { %p11_p8 = scmp.ge.s32.totalorder %s392_s11, 4   ;;  %s488_s6 = smov %s349_s7 }
 0x21a   : > { %s489_s7 = smov %s353_s8  ;;  %s490_s8 = smov %s402_s14 }
 0x21b   : > { %s491_s9 = smov %s392_s11  ;;  %13 = sbr.rel (!%p11_p8) target bundleno = 3 (0x3), region = 64 }
 0x222   :  { %189 = vsyncpa [#allocation3], 1 }
 0x223   :  { %191 = vsyncpa [#allocation3 + $0x1], 1 }

</bundles_post_ra>
